<compile_context>
chip_gen: v6e
topology: v6e:2x2x1
jax: 0.10.0
libtpu: 0.0.40
codegen_flags: <defaults>
</compile_context>

<pallas_src>
import functools

import numpy as np
import jax
import jax.numpy as jnp
from jax import lax
from jax.experimental import pallas as pl
from jax.experimental.pallas import tpu as pltpu


def _round_up(x, m):
    return (x + m - 1) // m * m


def _pad2d(a, rows, cols, dtype):
    r, c = a.shape
    return jnp.pad(a, ((0, rows - r), (0, cols - c))).astype(dtype)


# ----------------------------- fused Pallas kernel -----------------------------

def _make_fused_kernel(num_classes, with_probs):
    """kernel(x, w_img, pooled_T, w_txt_T, scale, out, img_acc, txtT_n)."""
    # TODO(synk): num_classes is closed over (static per trace). Fine here since
    # a class-count change also changes text_tokens' shape and forces a retrace;
    # pass it via an SMEM scalar if the padded class axis ever becomes static.

    def kernel(x_ref, w_img_ref, pooledT_ref, w_txtT_ref, scale_ref,
               out_ref, img_acc, txtT_n):
        k = pl.program_id(1)
        nk = pl.num_programs(1)
        eps = jnp.float32(1e-12)

        # ---- k == 0: init accumulator + the whole text path (hoisted) --------
        @pl.when(k == 0)
        def _():
            img_acc[...] = jnp.zeros_like(img_acc)
            # text features, already transposed: (Dp, Ep) @ (Ep, Tp) = (Dp, Tp)
            txtT = jnp.dot(w_txtT_ref[...], pooledT_ref[...],
                           preferred_element_type=jnp.float32)
            inv_n = lax.rsqrt(jnp.sum(txtT * txtT, axis=0, keepdims=True) + eps)
            txtT_n[...] = (txtT * inv_n).astype(txtT_n.dtype)   # bf16 scratch

        # ---- image encoder: tiled K reduction into an f32 VMEM accumulator ----
        img_acc[...] += jnp.dot(x_ref[...], w_img_ref[...],
                                preferred_element_type=jnp.float32)

        # ---- k == nk-1: normalize image feats + MXU-native logits (+ softmax) -
        @pl.when(k == nk - 1)
        def _():
            img = img_acc[...]                                        # (tm, Dp) f32
            img_n = img * lax.rsqrt(
                jnp.sum(img * img, axis=1, keepdims=True) + eps)
            scale = scale_ref[0, 0]                                   # exp(logit_scale)
            logits = scale * jnp.dot(img_n.astype(jnp.bfloat16), txtT_n[...],
                                     preferred_element_type=jnp.float32)  # (tm, Tp)
            if with_probs:
                # Mask the zero-padded class columns out of the softmax.
                col = lax.broadcasted_iota(jnp.int32, logits.shape, 1)
                masked = jnp.where(col < num_classes, logits,
                                   jnp.float32(-1e30))
                m = jnp.max(masked, axis=-1, keepdims=True)
                e = jnp.exp(masked - m)
                inv = pl.reciprocal(jnp.sum(e, axis=-1, keepdims=True),
                                    approx=True)
                out_ref[...] = e * inv
            else:
                out_ref[...] = logits

    return kernel


def clip_fused_forward(image_flat, w_img, pooled_txt, w_txt, logit_scale, *,
                       test):
    """Fused CLIP forward. Returns probs[B,T] if test else logits[B,T]."""
    B, K = image_flat.shape
    Kw, D = w_img.shape
    T, E = pooled_txt.shape
    Ew, Dw = w_txt.shape
    assert K == Kw and E == Ew and D == Dw

    # --- M (batch) tiling: 16-row bf16 sublane packing, 256-row tiles at scale.
    Bp = _round_up(B, 16)
    if Bp <= 256:
        tm = Bp
    else:
        tm = 256
        Bp = _round_up(B, tm)
    nm = Bp // tm

    # --- K tiling: large tiles (>=512 keeps the HBM stream near roofline); pad
    # K up to a multiple of tk — zero padding along K is numerically exact.
    tk = 1024 if K > 1024 else _round_up(K, 128)
    Kp = _round_up(K, tk)
    nk = Kp // tk

    Dp = _round_up(D, 128)
    Tp = _round_up(T, 128)     # lane-dense (tm, Tp) output stores
    Ep = _round_up(E, 128)

    # bf16 MXU operands (v6e/v7x peak), f32 accumulation inside the kernel.
    x = _pad2d(image_flat.astype(jnp.float32), Bp, Kp, jnp.bfloat16)
    wi = _pad2d(w_img, Kp, Dp, jnp.bfloat16)
    # Pre-transposed text operands so the logits matmul needs no in-kernel .T:
    ptT = _pad2d(pooled_txt.T, Ep, Tp, jnp.bfloat16)   # (Ep, Tp) = pooled.T
    wtT = _pad2d(w_txt.T, Dp, Ep, jnp.bfloat16)        # (Dp, Ep) = w_txt.T
    # exp(logit_scale) precomputed once; lives in SMEM inside the kernel.
    scale = jnp.exp(jnp.asarray(logit_scale, jnp.float32)).reshape(1, 1)

    # --- VMEM budget -> explicit, generation-portable vmem limit.
    vmem_need = (2 * 2 * (tm * tk + tk * Dp)      # bf16 x / w_img tiles, dbl-buffered
                 + 2 * 2 * (Ep * Tp + Dp * Ep)    # bf16 resident text operands (2 bufs)
                 + 2 * 4 * tm * Tp                # f32 output, dbl-buffered
                 + 4 * tm * Dp                    # f32 img accumulator scratch
                 + 2 * Dp * Tp)                   # bf16 normalized-text scratch
    assert vmem_need < (48 << 20), \
        "fused single-residency head; tile D / T for real CLIP encoder widths"
    vmem_limit = min(64 << 20,                    # <= v7x physical per-TC VMEM
                     max(int(vmem_need * 3 // 2) + (1 << 20), 4 << 20))
    # TODO(synk): at real CLIP widths also set pipeline_mode=pl.Buffered(1) on the
    # constant-index text operands / Buffered(3) on the K-streamed operands.

    kernel = _make_fused_kernel(num_classes=T, with_probs=test)

    in_specs = [
        pl.BlockSpec((tm, tk), lambda m, k: (m, k)),         # image rows, M/K tiled
        pl.BlockSpec((tk, Dp), lambda m, k: (k, 0)),         # image proj, K tiled
        pl.BlockSpec((Ep, Tp), lambda m, k: (0, 0)),         # pooled text^T (resident)
        pl.BlockSpec((Dp, Ep), lambda m, k: (0, 0)),         # text proj^T (resident)
        pl.BlockSpec(memory_space=pltpu.MemorySpace.SMEM),   # exp(logit_scale)
    ]
    out_specs = pl.BlockSpec((tm, Tp), lambda m, k: (m, 0))
    out_shape = jax.ShapeDtypeStruct((Bp, Tp), jnp.float32)

    out = pl.pallas_call(
        kernel,
        grid=(nm, nk),
        in_specs=in_specs,
        out_specs=out_specs,
        out_shape=out_shape,
        scratch_shapes=[pltpu.VMEM((tm, Dp), jnp.float32),     # image-feat acc
                        pltpu.VMEM((Dp, Tp), jnp.bfloat16)],   # normalized text^T
        compiler_params=pltpu.CompilerParams(
            dimension_semantics=("parallel", "arbitrary"),     # M parallel, K reduce
            vmem_limit_bytes=vmem_limit),
    )(x, wi, ptT, wtT, scale)

    return out[:B, :T]


# ------------------------------- model wrapper --------------------------------

@functools.partial(jax.jit, static_argnames=("test",))
def _forward_impl(image, text_tokens, w_img, token_embedding, w_txt,
                  logit_scale, *, test):
    B = image.shape[0]
    x = image.reshape(B, -1).astype(jnp.float32)            # NCHW flatten (glue)
    # TODO(synk): token-embedding gather + mean-pool stays in XLA; pulling it
    # in-kernel needs a PrefetchScalarGridSpec row gather and is pure latency
    # (not bandwidth) at T=8, L=8.
    emb = jnp.take(token_embedding, text_tokens, axis=0)     # (T, L, E)
    pooled = jnp.mean(emb, axis=1)                           # (T, E)
    return clip_fused_forward(x, w_img, pooled, w_txt, logit_scale, test=test)


class ClassIncrementalCLIPPallas:
    """Synthetic mini-CLIP matching forward_clip / ClassIncrementalCLIP.forward."""

    def __init__(self, key, *, channels=4, spatial=16, embed_dim=32,
                 vocab_size=64, token_embed_dim=32):
        k1, k2, k3 = jax.random.split(key, 3)
        in_dim = channels * spatial * spatial
        # Deterministic parameter init (stand-in for lora_clip.load weights).
        self.w_img = (jax.random.normal(k1, (in_dim, embed_dim), jnp.float32)
                      / np.sqrt(in_dim))
        self.token_embedding = (jax.random.normal(
            k2, (vocab_size, token_embed_dim), jnp.float32) * 0.02)
        self.w_txt = (jax.random.normal(k3, (token_embed_dim, embed_dim),
                                        jnp.float32)
                      / np.sqrt(token_embed_dim))
        self.logit_scale = jnp.asarray(np.log(1.0 / 0.07), jnp.float32)
        self.text_tokens = None   # set by `adaptation` in the original

    # ---- ClassIncrementalCLIP.forward (return_feature=False, replay=None) ----
    def forward(self, image, test=False):
        return _forward_impl(image, self.text_tokens, self.w_img,
                             self.token_embedding, self.w_txt,
                             self.logit_scale, test=test)


# ------------------------------ pure-JAX reference -----------------------------

def _reference_forward(image, text_tokens, model, test):
    B = image.shape[0]
    x = image.reshape(B, -1).astype(jnp.bfloat16)
    img = jnp.dot(x, model.w_img.astype(jnp.bfloat16),
                  preferred_element_type=jnp.float32)
    emb = jnp.take(model.token_embedding, text_tokens, axis=0)
    pooled = jnp.mean(emb, axis=1).astype(jnp.bfloat16)
    txt = jnp.dot(pooled, model.w_txt.astype(jnp.bfloat16),
                  preferred_element_type=jnp.float32)
    img = img / jnp.linalg.norm(img, axis=1, keepdims=True)
    txt = txt / jnp.linalg.norm(txt, axis=1, keepdims=True)
    logits = jnp.exp(model.logit_scale) * jnp.dot(
        img.astype(jnp.bfloat16), txt.astype(jnp.bfloat16).T,
        preferred_element_type=jnp.float32)
    return jax.nn.softmax(logits, axis=-1) if test else logits


# ------------------------------------ main -------------------------------------

if __name__ == "__main__":
    key = jax.random.PRNGKey(0)
    k_img, k_tok, k_param = jax.random.split(key, 3)

    B, C, H, W = 2, 4, 16, 16          # image: (batch, channels, H, W)  NCHW
    T, L, V = 8, 8, 64                 # T class prompts, context length L

    image = jax.random.normal(k_img, (B, C, H, W), jnp.float32)
    text_tokens = jax.random.randint(k_tok, (T, L), 0, V, jnp.int32)

    model = ClassIncrementalCLIPPallas(k_param, channels=C, spatial=H)
    model.text_tokens = text_tokens    # set by `adaptation` in the original

    logits = model.forward(image, test=False)   # (B, T) raw logits (train mode)
    probs = model.forward(image, test=True)     # (B, T) softmax (test mode)
    jax.block_until_ready((logits, probs))

    assert logits.shape == (B, T) and probs.shape == (B, T)
    assert np.allclose(np.asarray(jnp.sum(probs, axis=-1)), 1.0, atol=1e-2)

    ref_logits = _reference_forward(image, text_tokens, model, test=False)
    ref_probs = _reference_forward(image, text_tokens, model, test=True)
    assert np.allclose(np.asarray(logits), np.asarray(ref_logits),
                       rtol=2e-2, atol=2e-2)
    assert np.allclose(np.asarray(probs), np.asarray(ref_probs),
                       rtol=2e-2, atol=2e-2)

    print("KERNEL_OK")
</pallas_src>

<mosaic_0001>
module attributes {stable_mosaic.version = 11 : i64} {
  func.func @kernel(%arg0: i32, %arg1: i32, %arg2: memref<16x1024xbf16, #tpu.memory_space<vmem>>, %arg3: memref<1024x128xbf16, #tpu.memory_space<vmem>>, %arg4: memref<128x128xbf16, #tpu.memory_space<vmem>>, %arg5: memref<128x128xbf16, #tpu.memory_space<vmem>>, %arg6: memref<1x1xf32, #tpu.memory_space<smem>>, %arg7: memref<16x128xf32, #tpu.memory_space<vmem>>, %arg8: memref<16x128xf32, #tpu.memory_space<vmem>>, %arg9: memref<128x128xbf16, #tpu.memory_space<vmem>>) attributes {dimension_semantics = [#tpu.dimension_semantics<parallel>, #tpu.dimension_semantics<arbitrary>], iteration_bounds = array<i64: 1, 1>, scalar_prefetch = 0 : i64, scratch_operands = 2 : i64, tpu.core_type = #tpu.core_type<tc>, window_params = [{transform_indices = @transform_0, window_bounds = array<i64: 16, 1024>}, {transform_indices = @transform_1, window_bounds = array<i64: 1024, 128>}, {pipeline_mode = #tpu.pipeline_mode<synchronous>, transform_indices = @transform_2, window_bounds = array<i64: 128, 128>}, {pipeline_mode = #tpu.pipeline_mode<synchronous>, transform_indices = @transform_3, window_bounds = array<i64: 128, 128>}, {transform_indices = @transform_4, window_bounds = array<i64: 1, 1>}, {transform_indices = @transform_5, window_bounds = array<i64: 16, 128>}]} {
    %c0_i32 = arith.constant 0 : i32
    %0 = arith.cmpi eq, %arg1, %c0_i32 : i32
    %1 = arith.extui %0 : i1 to i32
    %cst = arith.constant 9.99999996E-13 : f32
    %c0_i32_0 = arith.constant 0 : i32
    %2 = arith.cmpi ne, %1, %c0_i32_0 : i32
    scf.if %2 {
      %cst_12 = arith.constant 0.000000e+00 : f32
      %12 = vector.broadcast %cst_12 : f32 to vector<16x128xf32>
      %c0_13 = arith.constant 0 : index
      %c0_14 = arith.constant 0 : index
      %13 = vector.load %arg8[%c0_13, %c0_14] : memref<16x128xf32, #tpu.memory_space<vmem>>, vector<16x128xf32>
      tpu.vector_store %arg8[%c0_13, %c0_14], %12 {strides = array<i32>} : memref<16x128xf32, #tpu.memory_space<vmem>>, vector<16x128xf32>,
      %c0_15 = arith.constant 0 : index
      %c0_16 = arith.constant 0 : index
      %14 = vector.load %arg5[%c0_15, %c0_16] : memref<128x128xbf16, #tpu.memory_space<vmem>>, vector<128x128xbf16>
      %c0_17 = arith.constant 0 : index
      %c0_18 = arith.constant 0 : index
      %15 = vector.load %arg4[%c0_17, %c0_18] : memref<128x128xbf16, #tpu.memory_space<vmem>>, vector<128x128xbf16>
      %cst_19 = arith.constant dense<0.000000e+00> : vector<128x128xf32>
      %16 = tpu.matmul %14, %15, %cst_19 {dimension_numbers = #tpu.dot_dimension_numbers<[1], [0], [0], [1], [0, 0, 1, 1], [], []>} : vector<128x128xbf16>, vector<128x128xbf16>, vector<128x128xf32> -> vector<128x128xf32>
      %17 = arith.mulf %16, %16 : vector<128x128xf32>
      %cst_20 = arith.constant dense<0.000000e+00> : vector<128xf32>
      %18 = vector.multi_reduction <add>, %17, %cst_20 [0] : vector<128x128xf32> to vector<128xf32>
      %19 = vector.shape_cast %18 : vector<128xf32> to vector<1x128xf32>
      %20 = vector.broadcast %cst : f32 to vector<1x128xf32>
      %21 = arith.addf %19, %20 : vector<1x128xf32>
      %22 = math.rsqrt %21 : vector<1x128xf32>
      %23 = vector.broadcast %22 : vector<1x128xf32> to vector<128x128xf32>
      %24 = arith.mulf %16, %23 : vector<128x128xf32>
      %25 = arith.truncf %24 : vector<128x128xf32> to vector<128x128xbf16>
      %c0_21 = arith.constant 0 : index
      %c0_22 = arith.constant 0 : index
      %26 = vector.load %arg9[%c0_21, %c0_22] : memref<128x128xbf16, #tpu.memory_space<vmem>>, vector<128x128xbf16>
      tpu.vector_store %arg9[%c0_21, %c0_22], %25 {strides = array<i32>} : memref<128x128xbf16, #tpu.memory_space<vmem>>, vector<128x128xbf16>,
    } else {
    }
    %c0 = arith.constant 0 : index
    %c0_1 = arith.constant 0 : index
    %3 = vector.load %arg8[%c0, %c0_1] : memref<16x128xf32, #tpu.memory_space<vmem>>, vector<16x128xf32>
    %c0_2 = arith.constant 0 : index
    %c0_3 = arith.constant 0 : index
    %4 = vector.load %arg2[%c0_2, %c0_3] : memref<16x1024xbf16, #tpu.memory_space<vmem>>, vector<16x1024xbf16>
    %c0_4 = arith.constant 0 : index
    %c0_5 = arith.constant 0 : index
    %5 = vector.load %arg3[%c0_4, %c0_5] : memref<1024x128xbf16, #tpu.memory_space<vmem>>, vector<1024x128xbf16>
    %cst_6 = arith.constant dense<0.000000e+00> : vector<16x128xf32>
    %6 = tpu.matmul %4, %5, %cst_6 {dimension_numbers = #tpu.dot_dimension_numbers<[1], [0], [0], [1], [0, 0, 1, 1], [], []>} : vector<16x1024xbf16>, vector<1024x128xbf16>, vector<16x128xf32> -> vector<16x128xf32>
    %7 = arith.addf %3, %6 : vector<16x128xf32>
    %c0_7 = arith.constant 0 : index
    %c0_8 = arith.constant 0 : index
    %8 = vector.load %arg8[%c0_7, %c0_8] : memref<16x128xf32, #tpu.memory_space<vmem>>, vector<16x128xf32>
    tpu.vector_store %arg8[%c0_7, %c0_8], %7 {strides = array<i32>} : memref<16x128xf32, #tpu.memory_space<vmem>>, vector<16x128xf32>,
    %c0_i32_9 = arith.constant 0 : i32
    %9 = arith.cmpi eq, %arg1, %c0_i32_9 : i32
    %10 = arith.extui %9 : i1 to i32
    %cst_10 = arith.constant 9.99999996E-13 : f32
    %c0_i32_11 = arith.constant 0 : i32
    %11 = arith.cmpi ne, %10, %c0_i32_11 : i32
    scf.if %11 {
      %c0_12 = arith.constant 0 : index
      %c0_13 = arith.constant 0 : index
      %12 = vector.load %arg8[%c0_12, %c0_13] : memref<16x128xf32, #tpu.memory_space<vmem>>, vector<16x128xf32>
      %13 = arith.mulf %12, %12 : vector<16x128xf32>
      %cst_14 = arith.constant dense<0.000000e+00> : vector<16xf32>
      %14 = vector.multi_reduction <add>, %13, %cst_14 [1] : vector<16x128xf32> to vector<16xf32>
      %15 = vector.shape_cast %14 : vector<16xf32> to vector<16x1xf32>
      %16 = vector.broadcast %cst_10 : f32 to vector<16x1xf32>
      %17 = arith.addf %15, %16 : vector<16x1xf32>
      %18 = math.rsqrt %17 : vector<16x1xf32>
      %19 = vector.broadcast %18 : vector<16x1xf32> to vector<16x128xf32>
      %20 = arith.mulf %12, %19 : vector<16x128xf32>
      %c0_15 = arith.constant 0 : index
      %c0_16 = arith.constant 0 : index
      %21 = memref.load %arg6[%c0_15, %c0_16] : memref<1x1xf32, #tpu.memory_space<smem>>
      %22 = arith.truncf %20 : vector<16x128xf32> to vector<16x128xbf16>
      %c0_17 = arith.constant 0 : index
      %c0_18 = arith.constant 0 : index
      %23 = vector.load %arg9[%c0_17, %c0_18] : memref<128x128xbf16, #tpu.memory_space<vmem>>, vector<128x128xbf16>
      %cst_19 = arith.constant dense<0.000000e+00> : vector<16x128xf32>
      %24 = tpu.matmul %22, %23, %cst_19 {dimension_numbers = #tpu.dot_dimension_numbers<[1], [0], [0], [1], [0, 0, 1, 1], [], []>} : vector<16x128xbf16>, vector<128x128xbf16>, vector<16x128xf32> -> vector<16x128xf32>
      %25 = vector.broadcast %21 : f32 to vector<16x128xf32>
      %26 = arith.mulf %25, %24 : vector<16x128xf32>
      %c0_20 = arith.constant 0 : index
      %c0_21 = arith.constant 0 : index
      %27 = vector.load %arg7[%c0_20, %c0_21] : memref<16x128xf32, #tpu.memory_space<vmem>>, vector<16x128xf32>
      tpu.vector_store %arg7[%c0_20, %c0_21], %26 {strides = array<i32>} : memref<16x128xf32, #tpu.memory_space<vmem>>, vector<16x128xf32>,
    } else {
    }
    return
  }
  func.func @transform_0(%arg0: i32, %arg1: i32) -> (i32, i32) {
    %c0_i32 = arith.constant 0 : i32
    return %arg0, %arg1 : i32, i32
  }
  func.func @transform_1(%arg0: i32, %arg1: i32) -> (i32, i32) {
    %c0_i32 = arith.constant 0 : i32
    %c0_i32_0 = arith.constant 0 : i32
    return %arg1, %c0_i32 : i32, i32
  }
  func.func @transform_2(%arg0: i32, %arg1: i32) -> (i32, i32) {
    %c0_i32 = arith.constant 0 : i32
    %c0_i32_0 = arith.constant 0 : i32
    %c0_i32_1 = arith.constant 0 : i32
    return %c0_i32, %c0_i32_0 : i32, i32
  }
  func.func @transform_3(%arg0: i32, %arg1: i32) -> (i32, i32) {
    %c0_i32 = arith.constant 0 : i32
    %c0_i32_0 = arith.constant 0 : i32
    %c0_i32_1 = arith.constant 0 : i32
    return %c0_i32, %c0_i32_0 : i32, i32
  }
  func.func @transform_4(%arg0: i32, %arg1: i32) -> (i32, i32) {
    %c0_i32 = arith.constant 0 : i32
    %c0_i32_0 = arith.constant 0 : i32
    %c0_i32_1 = arith.constant 0 : i32
    return %c0_i32, %c0_i32_0 : i32, i32
  }
  func.func @transform_5(%arg0: i32, %arg1: i32) -> (i32, i32) {
    %c0_i32 = arith.constant 0 : i32
    %c0_i32_0 = arith.constant 0 : i32
    return %arg0, %c0_i32 : i32, i32
  }
}

</mosaic_0001>

<bundles_post_ra>
// kernel: _forward_impl.1
= control target key start
LH: loop header
LB: loop body
LE: loop exit
PB: predicated region body
PF: predicated region fallthrough
CT: control target
= control target key end

     0   :  { %vm1688_vm0 = vmmov 0   ;;  %s2051_s2 = inlined_call_operand.vmem [shape: bf16[128,128], index: 2, kind: input, shape index: {}]   ;;  %s2052_s1 = inlined_call_operand.vmem [shape: bf16[1024,128], index: 1, kind: input, shape index: {}]   ;;  %s2053_s3 = inlined_call_operand.vmem [shape: bf16[128,128], index: 3, kind: input, shape index: {}]   ;;  %s2054_s0 = inlined_call_operand.vmem [shape: bf16[16,1024], index: 0, kind: input, shape index: {}]   ;;  %s2055_s4 = inlined_call_operand.<no memory space> [shape: f32[1,1], index: 4, kind: input, shape index: {}]   ;;  %s2056_s5 = inlined_call_operand.vmem [shape: f32[16,128], index: 5, kind: output, shape index: {}]  }
   0x1   :  { %v1593_v0 = vld [vmem:[%s2051_s2 + $0x38] sm:$0xff]   ;;  %v1596_v3 = vld [vmem:[%s2051_s2 + $0x30] sm:$0xff]   ;;  %v1599_v6 = vld [vmem:[%s2051_s2 + $0x28] sm:$0xff]  }
   0x2   :  { %v1594_v1 = vld [vmem:[%s2052_s1 + $0x78] sm:$0xff]   ;;  %1539 = vmatprep.subr.bf16.mxu0 %v1593_v0  ;;  %v1597_v4 = vld [vmem:[%s2052_s1 + $0x70] sm:$0xff]   ;;  %v1600_v7 = vld [vmem:[%s2052_s1 + $0x68] sm:$0xff]  }
   0x3   :  { %v1595_v2 = vld [vmem:[%s2052_s1 + $0x38] sm:$0xff]   ;;  %1540 = vmatpush3.bf16.msra.mxu0 %v1593_v0  ;;  %1442 = vmatprep.subr.bf16.mxu1 %v1594_v1  ;;  %v1598_v5 = vld [vmem:[%s2052_s1 + $0x30] sm:$0xff]   ;;  %v1601_v8 = vld [vmem:[%s2052_s1 + $0x28] sm:$0xff]  }
   0x4   :  { %1443 = vmatpush3.bf16.msra.mxu1 %v1595_v2  ;;  %1541 = vmatprep.subr.bf16.mxu0 %v1596_v3  ;;  %v1602_v9 = vld [vmem:[%s2051_s2 + $0x20] sm:$0xff]   ;;  %v1605_v12 = vld [vmem:[%s2051_s2 + $0x18] sm:$0xff]   ;;  %v1608_v15 = vld [vmem:[%s2051_s2 + $0x10] sm:$0xff]  }
   0x5   :  { %1444 = vmatprep.subr.bf16.mxu1 %v1597_v4  ;;  %v1603_v10 = vld [vmem:[%s2052_s1 + $0x60] sm:$0xff]   ;;  %v1606_v13 = vld [vmem:[%s2052_s1 + $0x58] sm:$0xff]   ;;  %v1609_v16 = vld [vmem:[%s2052_s1 + $0x50] sm:$0xff]  }
   0x6   :  { %v1604_v11 = vld [vmem:[%s2052_s1 + $0x20] sm:$0xff]   ;;  %v1607_v14 = vld [vmem:[%s2052_s1 + $0x18] sm:$0xff]   ;;  %v1610_v17 = vld [vmem:[%s2052_s1 + $0x10] sm:$0xff]  }
   0x7   :  { %1542 = vmatpush3.bf16.msra.mxu0 %v1596_v3  ;;  %v1611_v18 = vld [vmem:[%s2051_s2 + $0x8] sm:$0xff]   ;;  %v1616_v21 = vld [vmem:[%s2053_s3] sm:$0xff]   ;;  %v1619_v25 = vld [vmem:[%s2052_s1 + $0xf8] sm:$0xff]  }
   0x8   :  { %1445 = vmatpush3.bf16.msra.mxu1 %v1598_v5  ;;  %1543 = vmatprep.subr.bf16.mxu0 %v1599_v6  ;;  %v1612_v19 = vld [vmem:[%s2052_s1 + $0x48] sm:$0xff]   ;;  %v1614_v22 = vld [vmem:[%s2051_s2] sm:$0xff]   ;;  %v1621_v30 = vld [vmem:[%s2052_s1 + $0x178] sm:$0xff]  }
   0x9   :  { %1446 = vmatprep.subr.bf16.mxu1 %v1600_v7  ;;  %v1613_v20 = vld [vmem:[%s2052_s1 + $0x8] sm:$0xff]   ;;  %v1615_v23 = vld [vmem:[%s2052_s1 + $0x40] sm:$0xff]   ;;  %1555 = vmatprep.mubr.bf16.mxu0 %v1616_v21  ;;  %v1620_v31 = vld [vmem:[%s2052_s1 + $0xb8] sm:$0xff]  }
   0xa   :  { %v1617_v24 = vld [vmem:[%s2052_s1] sm:$0xff]   ;;  %v1618_v26 = vld [vmem:[%s2053_s3 + $0x8] sm:$0xff]   ;;  %v1622_v33 = vld [vmem:[%s2052_s1 + $0x138] sm:$0xff]  }
   0xb   :  { %1544 = vmatpush3.bf16.msra.mxu0 %v1599_v6  ;;  %v390_v27 = vld [vmem:[%s2054_s0] sm:$0xff]  ;;  %v1623_v34 = vld [vmem:[%s2052_s1 + $0xf0] sm:$0xff]   ;;  %v1628_v39 = vld [vmem:[%s2053_s3 + $0x18] sm:$0xff]  }
   0xc   :  { %1447 = vmatpush3.bf16.msra.mxu1 %v1601_v8  ;;  %1545 = vmatprep.subr.bf16.mxu0 %v1602_v9  ;;  %v394_v28 = vld [vmem:[%s2054_s0 + $0x20] sm:$0xff]  ;;  %v1624_v35 = vld [vmem:[%s2052_s1 + $0xb0] sm:$0xff]   ;;  %v1629_v40 = vld [vmem:[%s2052_s1 + $0xe8] sm:$0xff]  }
   0xd   :  { %1448 = vmatprep.subr.bf16.mxu1 %v1603_v10  ;;  %v1284_v29 = vcombine.high %v390_v27, %v394_v28  ;;  %v1283_v32 = vcombine.low %v390_v27, %v394_v28  ;;  %v1625_v36 = vld [vmem:[%s2052_s1 + $0x170] sm:$0xff]   ;;  %v1630_v41 = vld [vmem:[%s2052_s1 + $0xa8] sm:$0xff]   ;;  %v1633_v44 = vld [vmem:[%s2052_s1 + $0xe0] sm:$0xff]  }
   0xe   :  { %v1626_v37 = vld [vmem:[%s2053_s3 + $0x10] sm:$0xff]   ;;  %v1631_v42 = vld [vmem:[%s2052_s1 + $0x168] sm:$0xff]   ;;  %v1634_v45 = vld [vmem:[%s2052_s1 + $0xa0] sm:$0xff]  }
   0xf   :  { %1546 = vmatpush3.bf16.msra.mxu0 %v1602_v9  ;;  %982 = vmatprep.mubr.bf16.mxu1 %v1284_v29  ;;  %v1627_v38 = vld [vmem:[%s2052_s1 + $0x130] sm:$0xff]   ;;  %v1632_v43 = vld [vmem:[%s2052_s1 + $0x128] sm:$0xff]   ;;  %v1635_v46 = vld [vmem:[%s2052_s1 + $0x160] sm:$0xff]  }
  0x10   :  { %1449 = vmatpush3.bf16.msra.mxu1 %v1604_v11  ;;  %1547 = vmatprep.subr.bf16.mxu0 %v1605_v12  ;;  %v1636_v47 = vld [vmem:[%s2053_s3 + $0x20] sm:$0xff]   ;;  %v1638_v49 = vld [vmem:[%s2053_s3 + $0x28] sm:$0xff]   ;;  %v1639_v50 = vld [vmem:[%s2052_s1 + $0xd8] sm:$0xff]  }
  0x11   :  { %1450 = vmatprep.subr.bf16.mxu1 %v1606_v13  ;;  %v1637_v48 = vld [vmem:[%s2052_s1 + $0x120] sm:$0xff]   ;;  %v1640_v51 = vld [vmem:[%s2052_s1 + $0x98] sm:$0xff]   ;;  %v1643_v54 = vld [vmem:[%s2052_s1 + $0xd0] sm:$0xff]  }
  0x12   :  { %v1641_v52 = vld [vmem:[%s2052_s1 + $0x158] sm:$0xff]   ;;  %v1644_v55 = vld [vmem:[%s2052_s1 + $0x90] sm:$0xff]   ;;  %v1649_v60 = vld [vmem:[%s2052_s1 + $0xc8] sm:$0xff]  }
  0x13   :  { %1548 = vmatpush3.bf16.msra.mxu0 %v1605_v12  ;;  %v1642_v53 = vld [vmem:[%s2052_s1 + $0x118] sm:$0xff]   ;;  %v1645_v56 = vld [vmem:[%s2052_s1 + $0x150] sm:$0xff]   ;;  %v1650_v61 = vld [vmem:[%s2052_s1 + $0x88] sm:$0xff]  }
  0x14   :  { %1451 = vmatpush3.bf16.msra.mxu1 %v1607_v14  ;;  %1549 = vmatprep.subr.bf16.mxu0 %v1608_v15  ;;  %v1646_v57 = vld [vmem:[%s2053_s3 + $0x30] sm:$0xff]   ;;  %v1648_v59 = vld [vmem:[%s2053_s3 + $0x38] sm:$0xff]   ;;  %v1651_v62 = vld [vmem:[%s2052_s1 + $0x148] sm:$0xff]  }
  0x15   :  { %1452 = vmatprep.subr.bf16.mxu1 %v1609_v16  ;;  %v1647_v58 = vld [vmem:[%s2052_s1 + $0x110] sm:$0xff]   ;;  %v1652_v63 = vld [vmem:[%s2052_s1 + $0x108] sm:$0xff]   ;;  %v1653_v0 = vld [vmem:[%s2052_s1 + $0xc0] sm:$0xff]  }
  0x16   :  { %v1654_v1 = vld [vmem:[%s2052_s1 + $0x80] sm:$0xff]   ;;  %v391_v3 = vld [vmem:[%s2054_s0 + $0x8] sm:$0xff]  ;;  %v1657_v8 = vld [vmem:[%s2052_s1 + $0x1f8] sm:$0xff]  }
  0x17   :  { %1550 = vmatpush3.bf16.msra.mxu0 %v1608_v15  ;;  %v1655_v2 = vld [vmem:[%s2052_s1 + $0x140] sm:$0xff]   ;;  %v395_v4 = vld [vmem:[%s2054_s0 + $0x28] sm:$0xff]  ;;  %v392_v9 = vld [vmem:[%s2054_s0 + $0x10] sm:$0xff] }
  0x18   :  { %1453 = vmatpush3.bf16.msra.mxu1 %v1610_v17  ;;  %1551 = vmatprep.subr.bf16.mxu0 %v1611_v18  ;;  %v1285_v5 = vcombine.low %v391_v3, %v395_v4  ;;  %v1286_v6 = vcombine.high %v391_v3, %v395_v4  ;;  %v1656_v7 = vld [vmem:[%s2052_s1 + $0x100] sm:$0xff]   ;;  %v396_v10 = vld [vmem:[%s2054_s0 + $0x30] sm:$0xff]  ;;  %v1658_v13 = vld [vmem:[%s2052_s1 + $0x1b8] sm:$0xff]  }
  0x19   :  { %1454 = vmatprep.subr.bf16.mxu1 %v1612_v19  ;;  %v1287_v11 = vcombine.low %v392_v9, %v396_v10  ;;  %v1288_v12 = vcombine.high %v392_v9, %v396_v10  ;;  %v1659_v14 = vld [vmem:[%s2052_s1 + $0x1f0] sm:$0xff]   ;;  %v1661_v16 = vld [vmem:[%s2052_s1 + $0x1e8] sm:$0xff]   ;;  %v1664_v19 = vld [vmem:[%s2052_s1 + $0x1a0] sm:$0xff]  }
  0x1a   :  { %v1660_v15 = vld [vmem:[%s2052_s1 + $0x1b0] sm:$0xff]   ;;  %v1662_v17 = vld [vmem:[%s2052_s1 + $0x1a8] sm:$0xff]   ;;  %v1666_v21 = vld [vmem:[%s2052_s1 + $0x198] sm:$0xff]  }
  0x1b   :  { %1552 = vmatpush3.bf16.msra.mxu0 %v1611_v18  ;;  %v1663_v18 = vld [vmem:[%s2052_s1 + $0x1e0] sm:$0xff]   ;;  %v1669_v27 = vld [vmem:[%s2052_s1 + $0x1c8] sm:$0xff]  }
  0x1c   :  { %1455 = vmatpush3.bf16.msra.mxu1 %v1613_v20  ;;  %1553 = vmatprep.subr.bf16.mxu0 %v1614_v22  ;;  %v1665_v20 = vld [vmem:[%s2052_s1 + $0x1d8] sm:$0xff]   ;;  %v1670_v28 = vld [vmem:[%s2052_s1 + $0x188] sm:$0xff]   ;;  %v1671_v29 = vld [vmem:[%s2052_s1 + $0x1c0] sm:$0xff]  }
  0x1d   :  { %1456 = vmatprep.subr.bf16.mxu1 %v1615_v23  ;;  %v393_v23 = vld [vmem:[%s2054_s0 + $0x18] sm:$0xff] }
  0x1f   :  { %1554 = vmatpush3.bf16.msra.mxu0 %v1614_v22  ;;  %v1667_v22 = vld [vmem:[%s2052_s1 + $0x1d0] sm:$0xff]  }
  0x20   :  { %1457 = vmatpush3.bf16.msra.mxu1 %v1617_v24  ;;  %1464 = vmatprep.subr.bf16.mxu0 %v1619_v25  ;;  %v397_v24 = vld [vmem:[%s2054_s0 + $0x38] sm:$0xff] }
  0x21   :  { %1486 = vmatprep.subr.bf16.mxu1 %v1621_v30  ;;  %v1290_v25 = vcombine.high %v393_v23, %v397_v24  ;;  %v1672_v30 = vld [vmem:[%s2052_s1 + $0x180] sm:$0xff]  }
  0x22   :  { %1556 = vmatmul.mubr.bf16.vlgmr.msra.gmra.mxu0 %v1618_v26  ;;  %v1668_v26 = vld [vmem:[%s2052_s1 + $0x190] sm:$0xff]  }
  0x23   :  { %1465 = vmatpush3.bf16.msra.mxu0 %v1620_v31  ;;  %983 = vmatmul.mubr.bf16.vlgmr.msra.gmra.mxu1 %v1283_v32  ;;  %v1289_v31 = vcombine.low %v393_v23, %v397_v24  ;;  %v1687_v32 = vmov 0.0  }
  0x24   :  { %1487 = vmatpush3.bf16.msra.mxu1 %v1622_v33  ;;  %1466 = vmatprep.subr.bf16.mxu0 %v1623_v34 }
  0x25   :  { %1488 = vmatprep.subr.bf16.mxu1 %v1625_v36  ;;  %1559 = vmatprep.mubr.bf16.mxu0 %v1626_v37 }
  0x26   :  { %1064 = vmatprep.mubr.bf16.mxu1 %v1288_v12 }
  0x27   :  { %1467 = vmatpush3.bf16.msra.mxu0 %v1624_v35 }
  0x28   :  { %1489 = vmatpush3.bf16.msra.mxu1 %v1627_v38  ;;  %1468 = vmatprep.subr.bf16.mxu0 %v1629_v40 }
  0x29   :  { %1490 = vmatprep.subr.bf16.mxu1 %v1631_v42 }
  0x2a   :  { %1560 = vmatmul.mubr.bf16.gmra.mxu0 %v1628_v39 }
  0x2b   :  { %1469 = vmatpush3.bf16.msra.mxu0 %v1630_v41  ;;  %1563 = vmatprep.mubr.bf16.mxu0 %v1636_v47 }
  0x2c   :  { %1491 = vmatpush3.bf16.msra.mxu1 %v1632_v43  ;;  %1470 = vmatprep.subr.bf16.mxu0 %v1633_v44 }
  0x2d   :  { %1492 = vmatprep.subr.bf16.mxu1 %v1635_v46 }
  0x2f   :  { %1471 = vmatpush3.bf16.msra.mxu0 %v1634_v45 }
  0x30   :  { %1493 = vmatpush3.bf16.msra.mxu1 %v1637_v48  ;;  %1472 = vmatprep.subr.bf16.mxu0 %v1639_v50 }
  0x31   :  { %1494 = vmatprep.subr.bf16.mxu1 %v1641_v52 }
  0x32   :  { %1564 = vmatmul.mubr.bf16.gmra.mxu0 %v1638_v49 }
  0x33   :  { %1473 = vmatpush3.bf16.msra.mxu0 %v1640_v51  ;;  %1567 = vmatprep.mubr.bf16.mxu0 %v1646_v57 }
  0x34   :  { %1495 = vmatpush3.bf16.msra.mxu1 %v1642_v53  ;;  %1474 = vmatprep.subr.bf16.mxu0 %v1643_v54 }
  0x35   :  { %1496 = vmatprep.subr.bf16.mxu1 %v1645_v56 }
  0x37   :  { %1475 = vmatpush3.bf16.msra.mxu0 %v1644_v55 }
  0x38   :  { %1497 = vmatpush3.bf16.msra.mxu1 %v1647_v58  ;;  %1476 = vmatprep.subr.bf16.mxu0 %v1649_v60 }
  0x39   :  { %1498 = vmatprep.subr.bf16.mxu1 %v1651_v62 }
  0x3a   :  { %1568 = vmatmul.mubr.bf16.gmra.mxu0 %v1648_v59 }
  0x3b   :  { %1477 = vmatpush3.bf16.msra.mxu0 %v1650_v61  ;;  %1023 = vmatprep.mubr.bf16.mxu0 %v1286_v6 }
  0x3c   :  { %1499 = vmatpush3.bf16.msra.mxu1 %v1652_v63  ;;  %1478 = vmatprep.subr.bf16.mxu0 %v1653_v0 }
  0x3d   :  { %1500 = vmatprep.subr.bf16.mxu1 %v1655_v2 }
  0x3f   :  { %1479 = vmatpush3.bf16.msra.mxu0 %v1654_v1 }
  0x40   :  { %1501 = vmatpush3.bf16.msra.mxu1 %v1656_v7  ;;  %1508 = vmatprep.subr.bf16.mxu0 %v1657_v8 }
  0x41   :  { %1571 = vmatprep.subr.bf16.mxu1 %v1687_v32 }
  0x42   :  { %1024 = vmatmul.mubr.bf16.vlgmr.msra.gmra.mxu0 %v1285_v5 }
  0x43   :  { %1509 = vmatpush3.bf16.msra.mxu0 %v1658_v13  ;;  %1065 = vmatmul.mubr.bf16.vlgmr.msra.gmra.mxu1 %v1287_v11 }
  0x44   :  { %1510 = vmatprep.subr.bf16.mxu0 %v1659_v14  ;;  %1105 = vmatprep.mubr.bf16.mxu0 %v1290_v25 }
  0x45   :  { %1587 = vmatprep.mubr.msk.bf16.mxu1 %vm1688_vm0, %v1687_v32 }
  0x47   :  { %1511 = vmatpush3.bf16.msra.mxu0 %v1660_v15 }
  0x48   :  { %1512 = vmatprep.subr.bf16.mxu0 %v1661_v16 }
  0x4b   :  { %1513 = vmatpush3.bf16.msra.mxu0 %v1662_v17 }
  0x4c   :  { %1514 = vmatprep.subr.bf16.mxu0 %v1663_v18 }
  0x4f   :  { %1515 = vmatpush3.bf16.msra.mxu0 %v1664_v19 }
  0x50   :  { %1516 = vmatprep.subr.bf16.mxu0 %v1665_v20 }
  0x53   :  { %1517 = vmatpush3.bf16.msra.mxu0 %v1666_v21 }
  0x54   :  { %1518 = vmatprep.subr.bf16.mxu0 %v1667_v22 }
  0x57   :  { %1519 = vmatpush3.bf16.msra.mxu0 %v1668_v26 }
  0x58   :  { %1520 = vmatprep.subr.bf16.mxu0 %v1669_v27 }
  0x5b   :  { %1521 = vmatpush3.bf16.msra.mxu0 %v1670_v28 }
  0x5c   :  { %1522 = vmatprep.subr.bf16.mxu0 %v1671_v29 }
  0x5f   :  { %1523 = vmatpush3.bf16.msra.mxu0 %v1672_v30 }
  0x62   :  { %1106 = vmatmul.mubr.bf16.vlgmr.msra.gmra.mxu0 %v1289_v31 }
  0xe2   :  { %v1984_v33 = vpop.f32.mrf.mxu0 }
  0xe3   :  { %v255_v40 = vmul.f32 %v1984_v33, %v1984_v33  ;;  %v1458_v13 = vpop.f32.mrf.mxu1 }
  0xe4   :  { %v1986_v34 = vpop.f32.mrf.mxu0 }
  0xe5   :  { %v253_v37 = vmul.f32 %v1986_v34, %v1986_v34  ;;  %v1459_v17 = vpop.f32.mrf.mxu1 }
  0xe6   :  { %v1988_v35 = vpop.f32.mrf.mxu0 }
  0xe7   :  { %v256_v43 = vmul.f32 %v1988_v35, %v1988_v35  ;;  %v1461_v20 = vpop.f32.mrf.mxu1 }
  0xe8   :  { %v1990_v36 = vpop.f32.mrf.mxu0 }
  0xe9   :  { %v254_v38 = vmul.f32 %v1990_v36, %v1990_v36  ;;  %v1462_v24 = vpop.f32.mrf.mxu1 }
  0xea   :  { %v1996_v39 = vpop.f32.mrf.mxu0 }
  0xeb   :  { %v269_v41 = vadd.f32 %v254_v38, %v253_v37  ;;  %v259_v52 = vmul.f32 %v1996_v39, %v1996_v39 }
  0xec   :  { %v2000_v42 = vpop.f32.mrf.mxu0 }
  0xed   :  { %v270_v44 = vadd.f32 %v269_v41, %v255_v40  ;;  %v257_v46 = vmul.f32 %v2000_v42, %v2000_v42  ;;  %v1460_v41 = vadd.f32 %v1459_v17, %v1458_v13 }
  0xee   :  { %v2004_v45 = vpop.f32.mrf.mxu0 }
  0xef   :  { %v271_v47 = vadd.f32 %v270_v44, %v256_v43  ;;  %v260_v55 = vmul.f32 %v2004_v45, %v2004_v45 }
  0xf0   :  { %v2008_v48 = vpop.f32.mrf.mxu0 }
  0xf1   :  { %v272_v49 = vadd.f32 %v271_v47, %v257_v46  ;;  %v258_v50 = vmul.f32 %v2008_v48, %v2008_v48 }
  0xf2   :  { %v2012_v51 = vpop.f32.mrf.mxu0 }
  0xf3   :  { %v273_v53 = vadd.f32 %v272_v49, %v258_v50  ;;  %v263_v0 = vmul.f32 %v2012_v51, %v2012_v51  ;;  %v1463_v49 = vadd.f32 %v1462_v24, %v1461_v20 }
  0xf4   :  { %v2016_v54 = vpop.f32.mrf.mxu0 }
  0xf5   :  { %v274_v56 = vadd.f32 %v273_v53, %v259_v52  ;;  %v261_v58 = vmul.f32 %v2016_v54, %v2016_v54 }
  0xf6   :  { %v1566_v57 = vpop.f32.mrf.mxu0 }
  0xf7   :  { %v275_v59 = vadd.f32 %v274_v56, %v260_v55  ;;  %v264_v3 = vmul.f32 %v1566_v57, %v1566_v57 }
  0xf8   :  { %v225_v60 = vpop.f32.mrf.mxu0 }
  0xf9   :  { %v276_v61 = vadd.f32 %v275_v59, %v261_v58  ;;  %v262_v62 = vmul.f32 %v225_v60, %v225_v60 }
  0xfa   :  { %v1569_v63 = vpop.f32.mrf.mxu0 }
  0xfb   :  { %v277_v1 = vadd.f32 %v276_v61, %v262_v62  ;;  %v267_v11 = vmul.f32 %v1569_v63, %v1569_v63 }
  0xfc   :  { %v238_v2 = vpop.f32.mrf.mxu0 }
  0xfd   :  { %v278_v4 = vadd.f32 %v277_v1, %v263_v0  ;;  %v265_v6 = vmul.f32 %v238_v2, %v238_v2 }
  0xfe   :  { %v1570_v5 = vpop.f32.mrf.mxu0 }
  0xff   :  { %v279_v7 = vadd.f32 %v278_v4, %v264_v3  ;;  %v268_v14 = vmul.f32 %v1570_v5, %v1570_v5 }
 0x100   :  { %v241_v8 = vpop.f32.mrf.mxu0 }
 0x101   :  { %v280_v9 = vadd.f32 %v279_v7, %v265_v6  ;;  %v266_v10 = vmul.f32 %v241_v8, %v241_v8 }
 0x102   :  { %v1480_v25 = vpop.f32.mrf.mxu0 }
 0x103   :  { %v281_v12 = vadd.f32 %v280_v9, %v266_v10  ;;  %v1502_v29 = vpop.f32.mrf.mxu1 }
 0x104   :  { %v1481_v28 = vpop.f32.mrf.mxu0 }
 0x105   :  { %v282_v15 = vadd.f32 %v281_v12, %v267_v11  ;;  %v1503_v31 = vpop.f32.mrf.mxu1  ;;  %v1482_v37 = vadd.f32 %v1481_v28, %v1480_v25 }
 0x106   :  { %v1483_v30 = vpop.f32.mrf.mxu0  ;;  %v1504_v44 = vadd.f32 %v1503_v31, %v1502_v29 }
 0x107   :  { %v283_v16 = vadd.f32 %v282_v15, %v268_v14  ;;  %v1505_v40 = vpop.f32.mrf.mxu1  ;;  %v1026_v43 = vadd.f32 %v1482_v37, %v1460_v41 }
 0x108   :  { %v1484_v38 = vpop.f32.mrf.mxu0 }
 0x109   :  { %v284_v18 = vrot.slane %v283_v16, 4  ;;  %v1485_v46 = vadd.f32 %v1484_v38, %v1483_v30  ;;  %v1506_v47 = vpop.f32.mrf.mxu1  ;;  %v1067_v52 = vadd.f32 %v1504_v44, %v1026_v43 }
 0x10a   :  { %v1507_v55 = vadd.f32 %v1506_v47, %v1505_v40  ;;  %v1242_v40 = vstv %s2055_s4 }
 0x10b   :  { %v285_v19 = vadd.f32 %v284_v18, %v283_v16  ;;  %v1029_v53 = vadd.f32 %v1485_v46, %v1463_v49 }
 0x10d   :  { %v286_v21 = vrot.slane %v285_v19, 2 }
 0x10f   :  { %v287_v22 = vadd.f32 %v286_v21, %v285_v19 }
 0x111   :  { %v288_v23 = vrot.slane %v287_v22, 1 }
 0x113   :  { %v289_v26 = vadd.f32 %v288_v23, %v287_v22 }
 0x115   :  { %v290_v27 = vadd.f32 1e-12, %v289_v26 }
 0x117   :  { %1681 = vrsqrt.f32 %v290_v27 }
 0x122   :  { %v1524_v56 = vpop.f32.mrf.mxu0 }
 0x124   :  { %v1682_v50 = vpop.eup %1681  ;;  %v1525_v0 = vpop.f32.mrf.mxu0 }
 0x125   :  { %v304_v58 = vmul.f32 %v1682_v50, %v238_v2  ;;  %v305_v59 = vmul.f32 %v1682_v50, %v241_v8  ;;  %v306_v61 = vmul.f32 %v1682_v50, %v1569_v63  ;;  %v307_v62 = vmul.f32 %v1682_v50, %v1570_v5 }
 0x126   :  { %v302_v1 = vmul.f32 %v1682_v50, %v2012_v51  ;;  %v303_v3 = vmul.f32 %v1682_v50, %v1566_v57  ;;  %v300_v4 = vmul.f32 %v1682_v50, %v2016_v54  ;;  %v301_v6 = vmul.f32 %v1682_v50, %v225_v60  ;;  %v1527_v12 = vpop.f32.mrf.mxu0 }
 0x127   :  { %v1412_v7 = vpack.c.bf16 %v305_v59, %v304_v58  ;;  %v1526_v9 = vadd.f32 %v1525_v0, %v1524_v56  ;;  %v1417_v10 = vpack.c.bf16 %v307_v62, %v306_v61  ;;  %v298_v11 = vmul.f32 %v1682_v50, %v1996_v39 }
 0x128   :  { %v1407_v13 = vpack.c.bf16 %v303_v3, %v302_v1  ;;  %v1402_v14 = vpack.c.bf16 %v301_v6, %v300_v4  ;;  %v299_v2 = vmul.f32 %v1682_v50, %v2004_v45  ;;  %v296_v63 = vmul.f32 %v1682_v50, %v2000_v42  ;;  %v1528_v8 = vpop.f32.mrf.mxu0 }
 0x129   :  { %1424 = vst [vmem:[#allocation3 + $0x30] sm:$0xff] %v1412_v7   ;;  %v1108_v5 = vadd.f32 %v1526_v9, %v1067_v52  ;;  %1425 = vst [vmem:[#allocation3 + $0x38] sm:$0xff] %v1417_v10   ;;  %v297_v51 = vmul.f32 %v1682_v50, %v2008_v48  ;;  %v294_v54 = vmul.f32 %v1682_v50, %v1984_v33 }
 0x12a   :  { %v295_v57 = vmul.f32 %v1682_v50, %v1988_v35  ;;  %v1070_v60 = vadd.f32 %v1507_v55, %v1029_v53  ;;  %1423 = vst [vmem:[#allocation3 + $0x28] sm:$0xff] %v1407_v13   ;;  %1422 = vst [vmem:[#allocation3 + $0x20] sm:$0xff] %v1402_v14   ;;  %v1397_v39 = vpack.c.bf16 %v299_v2, %v298_v11 }
 0x12b   :  { %v292_v15 = vmul.f32 %v1682_v50, %v1986_v34  ;;  %v293_v45 = vmul.f32 %v1682_v50, %v1990_v36  ;;  %v1529_v16 = vadd.f32 %v1528_v8, %v1527_v12  ;;  %v1123_v42 = vmul.f32 %v1108_v5, %v1108_v5 }
 0x12c   :  { %v1392_v17 = vpack.c.bf16 %v297_v51, %v296_v63  ;;  %v1387_v18 = vpack.c.bf16 %v295_v57, %v294_v54  ;;  %1421 = vst [vmem:[#allocation3 + $0x18] sm:$0xff] %v1397_v39  }
 0x12d   :  { %v1382_v19 = vpack.c.bf16 %v293_v45, %v292_v15  ;;  %v1111_v48 = vadd.f32 %v1529_v16, %v1070_v60  ;;  %1125 = vadd.xlane.f32.xlu0 %v1123_v42 }
 0x12e   :  { %1420 = vst [vmem:[#allocation3 + $0x10] sm:$0xff] %v1392_v17   ;;  %1419 = vst [vmem:[#allocation3 + $0x8] sm:$0xff] %v1387_v18  }
 0x12f   :  { %1383 = vst [vmem:[#allocation3] sm:$0xff] %v1382_v19   ;;  %v1124_v33 = vmul.f32 %v1111_v48, %v1111_v48 }
 0x130   :  { %v1673_v35 = vld [vmem:[#allocation3 + $0x38] sm:$0xff]   ;;  %v1674_v34 = vld [vmem:[#allocation3 + $0x30] sm:$0xff]  }
 0x131   :  { %1127 = vadd.xlane.f32.xlu0 %v1124_v33  ;;  %1572 = vmatpush3.bf16.msra.mxu1 %v1673_v35  ;;  %v1675_v36 = vld [vmem:[#allocation3 + $0x28] sm:$0xff]   ;;  %v1676_v20 = vld [vmem:[#allocation3 + $0x20] sm:$0xff]  }
 0x132   :  { %1573 = vmatprep.subr.bf16.mxu1 %v1687_v32 }
 0x133   :  { %v1677_v21 = vld [vmem:[#allocation3 + $0x18] sm:$0xff]  }
 0x135   :  { %1574 = vmatpush3.bf16.msra.mxu1 %v1674_v34  ;;  %v1678_v22 = vld [vmem:[#allocation3 + $0x10] sm:$0xff]   ;;  %v1679_v23 = vld [vmem:[#allocation3 + $0x8] sm:$0xff]  }
 0x136   :  { %1575 = vmatprep.subr.bf16.mxu1 %v1687_v32  ;;  %v1680_v24 = vld [vmem:[#allocation3] sm:$0xff]  }
 0x139   :  { %1576 = vmatpush3.bf16.msra.mxu1 %v1675_v36 }
 0x13a   :  { %1577 = vmatprep.subr.bf16.mxu1 %v1687_v32 }
 0x13d   :  { %1578 = vmatpush3.bf16.msra.mxu1 %v1676_v20 }
 0x13e   :  { %1579 = vmatprep.subr.bf16.mxu1 %v1687_v32 }
 0x141   :  { %1580 = vmatpush3.bf16.msra.mxu1 %v1677_v21 }
 0x142   :  { %1581 = vmatprep.subr.bf16.mxu1 %v1687_v32 }
 0x145   :  { %1582 = vmatpush3.bf16.msra.mxu1 %v1678_v22 }
 0x146   :  { %1583 = vmatprep.subr.bf16.mxu1 %v1687_v32 }
 0x149   :  { %1584 = vmatpush3.bf16.msra.mxu1 %v1679_v23 }
 0x14a   :  { %1585 = vmatprep.subr.bf16.mxu1 %v1687_v32 }
 0x14d   :  { %1586 = vmatpush3.bf16.msra.mxu1 %v1680_v24 }
 0x1b6   :  { %v1126_v25 = vpop.xlane.xlu0 %1125 }
 0x1b7   :  { %v1129_v26 = vadd.f32 1e-12, %v1126_v25 }
 0x1b9   :  { %1683 = vrsqrt.f32 %v1129_v26 }
 0x1ba   :  { %v1128_v27 = vpop.xlane.xlu0 %1127 }
 0x1bb   :  { %v1130_v28 = vadd.f32 1e-12, %v1128_v27 }
 0x1bd   :  { %1685 = vrsqrt.f32 %v1130_v28 }
 0x1c6   :  { %v1684_v29 = vpop.eup %1683 }
 0x1c7   :  { %v1133_v31 = vmul.f32 %v1684_v29, %v1108_v5 }
 0x1ca   :  { %v1686_v30 = vpop.eup %1685 }
 0x1cb   :  { %v1134_v37 = vmul.f32 %v1686_v30, %v1111_v48 }
 0x1cd   :  { %v1136_v38 = vpack.c.bf16 %v1134_v37, %v1133_v31 }
 0x1cf   :  { %1588 = vmatmul.mubr.bf16.vlgmr.msra.gmra.mxu1 %v1136_v38 }
 0x28f   :  { %v1235_v41 = vpop.f32.mrf.mxu1 }
 0x290   :  { %v1243_v32 = vmul.f32 %v1242_v40, %v1235_v41 }
 0x291   :  { %v1589_v43 = vpop.f32.mrf.mxu1 }
 0x292   :  { %1245 = vst [vmem:[%s2056_s5] sm:$0xff] %v1243_v32 }
 0x293   :  { %v1238_v44 = vpop.f32.mrf.mxu1 }
 0x294   :  { %v1244_v46 = vmul.f32 %v1242_v40, %v1238_v44 }
 0x295   :  { %v1590_v47 = vpop.f32.mrf.mxu1 }
 0x296   :  { %1246 = vst [vmem:[%s2056_s5 + $0x8] sm:$0xff] %v1244_v46 }

</bundles_post_ra>
